<compile_context>
chip_gen: v5e
topology: v5e:2x2
jax: 0.10.0
libtpu: 0.0.40
codegen_flags: <defaults>
</compile_context>

<pallas_src>
import functools

import jax
import jax.numpy as jnp
from jax.experimental import pallas as pl
from jax.experimental.pallas import tpu as pltpu


def _ctrgc_kernel(xr_ref, w12_ref, db_ref, w3e_ref, b3e_ref, w4e_ref, addc_ref,
                  out_ref, *, rel_channels, out_channels, t_frames, vertices):
    """One batch sample per grid step.  All matmuls NN-form, bf16 MXU operands."""
    R, O, T, V = rel_channels, out_channels, t_frames, vertices
    f32 = jnp.float32
    nn = (((1,), (0,)), ((), ()))                   # (M, K) @ (K, N)

    xr = xr_ref[0]                                  # (Cin*T, V)  bf16

    # ---- relation head (critical path) -------------------------------------
    # conv1 | conv2 with the 1/T mean folded into the (c, t) contraction.
    x12 = jax.lax.dot_general(w12_ref[...], xr, nn,
                              preferred_element_type=f32)            # (2R, V)
    x1 = x12[:R, :] + db_ref[...]                                    # (R, V)  (+ (b1-b2))
    x2 = x12[R:, :]                                                  # (R, V)
    # pre-transposed relation: m_t[r, v, u] = tanh(x1[r, u] - x2[r, v])
    m = jnp.tanh(x1[:, None, :] - x2[:, :, None])                    # (R, V, V) f32
    m2 = m.reshape(R * V, V).astype(jnp.bfloat16)                    # tile-aligned merge (free)

    # conv4 (alpha folded) with Kronecker-expanded weight -> output already in
    # (o,v)-major rows: a4[(o,v),u] = sum_r a*w4[o,r]*m_t[r,v,u] + a*b4[o] + A^T[v,u]
    a4 = jax.lax.dot_general(w4e_ref[...], m2, nn,
                             preferred_element_type=f32) + addc_ref[...]   # (O*V, V)

    # ---- value branch (off the critical path) ------------------------------
    # conv3 with Kronecker-expanded weight -> output already in (o,t)-major rows.
    x3 = jax.lax.dot_general(w3e_ref[...], xr, nn,
                             preferred_element_type=f32) + b3e_ref[...]    # (O*T, V)

    # ---- graph aggregation: out[o,t,u] = sum_v x3[o,t,v] * a4t[o,v,u] ------
    x3b = x3.reshape(O, T, V).astype(jnp.bfloat16)    # tile-aligned split (free)
    a4b = a4.reshape(O, V, V).astype(jnp.bfloat16)    # tile-aligned split (free)
    out = jax.lax.dot_general(x3b, a4b, (((2,), (1,)), ((0,), (0,))),
                              preferred_element_type=f32)             # (O, T, V)
    out_ref[0] = out.astype(out_ref.dtype)


def ctrgc_forward(x, w1, b1, w2, b2, w3, b3, w4, b4, A=None, alpha=1.0):
    """CTRGC forward. x: (N, Cin, T, V); wi: (out_ch, in_ch) 1x1-conv weights;
    bi: (out_ch,) biases; A: (V, V) or None; returns (N, out_channels, T, V)."""
    N, Cin, T, V = x.shape
    R = w1.shape[0]
    O = w3.shape[0]
    f32, bf16 = jnp.float32, jnp.bfloat16
    if A is None:
        A = jnp.zeros((V, V), f32)
    alpha = jnp.asarray(alpha, f32)

    # ---- one-time parameter folds (tiny tensors; wrapper-side layout plumbing) ----
    # x in the single layout every in-kernel consumer needs: (N, Cin*T, V).
    xr = x.reshape(N, Cin * T, V).astype(bf16)

    # conv1|conv2 with the 1/T mean folded in (contraction depth Cin*T).
    w12 = jnp.concatenate([w1, w2], axis=0).astype(f32)                    # (2R, Cin)
    w12t = (jnp.repeat(w12, T, axis=1) / T).astype(bf16)                   # (2R, Cin*T)
    db = (b1 - b2).reshape(R, 1).astype(f32)                               # only the diff matters

    # conv3 expanded so its output rows are (o, t):  W3E[(o,t),(c,t')] = w3[o,c]*delta(t,t')
    w3e = jnp.kron(w3.astype(f32), jnp.eye(T, dtype=f32)).astype(bf16)     # (O*T, Cin*T)
    b3e = jnp.repeat(b3.astype(f32), T).reshape(O * T, 1)                  # (O*T, 1)

    # conv4 (alpha folded) expanded so its output rows are (o, v) — i.e. already
    # transposed for the final contraction; the adjacency enters as A^T.
    w4e = jnp.kron((alpha * w4).astype(f32),
                   jnp.eye(V, dtype=f32)).astype(bf16)                     # (O*V, R*V)
    addc = (jnp.repeat(alpha * b4.astype(f32), V).reshape(O * V, 1)
            + jnp.tile(A.T.astype(f32), (O, 1)))                           # (O*V, V)

    kern = functools.partial(_ctrgc_kernel, rel_channels=R, out_channels=O,
                             t_frames=T, vertices=V)

    # Advisory cost hint for XLA's scheduler.
    macs = N * (2 * R * Cin * T * V + (O * T) * (Cin * T) * V
                + (O * V) * (R * V) * V + O * T * V * V)
    cost = pl.CostEstimate(
        flops=2 * macs,
        transcendentals=N * R * V * V,
        bytes_accessed=(xr.size + w12t.size + w3e.size + w4e.size) * 2
        + (db.size + b3e.size + addc.size + N * O * T * V) * 4)

    out = pl.pallas_call(
        kern,
        out_shape=jax.ShapeDtypeStruct((N, O, T, V), jnp.float32),
        grid=(N,),                                   # batch on a parallel grid axis
        in_specs=[
            pl.BlockSpec((1, Cin * T, V), lambda n: (n, 0, 0)),
            pl.BlockSpec((2 * R, Cin * T), lambda n: (0, 0)),
            pl.BlockSpec((R, 1), lambda n: (0, 0)),
            pl.BlockSpec((O * T, Cin * T), lambda n: (0, 0)),
            pl.BlockSpec((O * T, 1), lambda n: (0, 0)),
            pl.BlockSpec((O * V, R * V), lambda n: (0, 0)),
            pl.BlockSpec((O * V, V), lambda n: (0, 0)),
        ],
        out_specs=pl.BlockSpec((1, O, T, V), lambda n: (n, 0, 0, 0)),
        compiler_params=pltpu.CompilerParams(
            dimension_semantics=("parallel",)),      # v7x: one sample per TensorCore
        cost_estimate=cost,
    )(xr, w12t, db, w3e, b3e, w4e, addc)
    return out


def _reference(x, w1, b1, w2, b2, w3, b3, w4, b4, A, alpha):
    """Pure-JAX (f32, highest precision) reference of the PyTorch CTRGC forward."""
    hp = jax.lax.Precision.HIGHEST
    x1 = jnp.einsum('rc,nctv->nrtv', w1, x, precision=hp).mean(axis=2) + b1[None, :, None]
    x2 = jnp.einsum('rc,nctv->nrtv', w2, x, precision=hp).mean(axis=2) + b2[None, :, None]
    x3 = jnp.einsum('oc,nctv->notv', w3, x, precision=hp) + b3[None, :, None, None]
    m = jnp.tanh(x1[..., :, None] - x2[..., None, :])                       # (N,R,V,V)
    a4 = jnp.einsum('or,nruv->nouv', w4, m, precision=hp) + b4[None, :, None, None]
    a4 = a4 * alpha + A[None, None]
    return jnp.einsum('nouv,notv->notu', a4, x3, precision=hp)


if __name__ == "__main__":
    # in_channels == 3  ->  rel_channels = 8 (per the module's constructor)
    N, Cin, T, V = 2, 3, 16, 16
    R, O = 8, 16
    alpha = 0.5

    key = jax.random.PRNGKey(0)
    kx, k1, k2, k3, k4, ka, kb = jax.random.split(key, 7)
    x = jax.random.normal(kx, (N, Cin, T, V), jnp.float32)

    # Conv2d(Cin, Co, 1) weights, kaiming_normal_(mode='fan_out'): std = sqrt(2/Co)
    w1 = (2.0 / R) ** 0.5 * jax.random.normal(k1, (R, Cin), jnp.float32)
    w2 = (2.0 / R) ** 0.5 * jax.random.normal(k2, (R, Cin), jnp.float32)
    w3 = (2.0 / O) ** 0.5 * jax.random.normal(k3, (O, Cin), jnp.float32)
    w4 = (2.0 / O) ** 0.5 * jax.random.normal(k4, (O, R), jnp.float32)
    # conv_init zeroes the biases; use small non-zero ones to exercise the folds.
    kb1, kb2, kb3, kb4 = jax.random.split(kb, 4)
    b1 = 0.1 * jax.random.normal(kb1, (R,), jnp.float32)
    b2 = 0.1 * jax.random.normal(kb2, (R,), jnp.float32)
    b3 = 0.1 * jax.random.normal(kb3, (O,), jnp.float32)
    b4 = 0.1 * jax.random.normal(kb4, (O,), jnp.float32)
    A = 0.1 * jax.random.normal(ka, (V, V), jnp.float32)     # shared adjacency

    fwd = jax.jit(ctrgc_forward)
    out = jax.block_until_ready(fwd(x, w1, b1, w2, b2, w3, b3, w4, b4, A, alpha))

    ref = _reference(x, w1, b1, w2, b2, w3, b3, w4, b4, A, alpha)
    assert out.shape == (N, O, T, V), out.shape
    assert out.dtype == jnp.float32
    assert bool(jnp.all(jnp.isfinite(out)))
    # bf16 MXU operands (f32 accumulate): expected error is O(1e-2) on O(1) outputs.
    max_err = float(jnp.max(jnp.abs(out - ref)))
    assert bool(jnp.allclose(out, ref, rtol=8e-2, atol=8e-2)), max_err
    assert float(jnp.mean(jnp.abs(out - ref))) < 2e-2, max_err
    print("KERNEL_OK")
</pallas_src>

<mosaic_0001>
module attributes {stable_mosaic.version = 11 : i64} {
  func.func @_ctrgc_kernel(%arg0: i32, %arg1: memref<1x48x16xbf16, #tpu.memory_space<vmem>>, %arg2: memref<16x48xbf16, #tpu.memory_space<vmem>>, %arg3: memref<8x1xf32, #tpu.memory_space<vmem>>, %arg4: memref<256x48xbf16, #tpu.memory_space<vmem>>, %arg5: memref<256x1xf32, #tpu.memory_space<vmem>>, %arg6: memref<256x128xbf16, #tpu.memory_space<vmem>>, %arg7: memref<256x16xf32, #tpu.memory_space<vmem>>, %arg8: memref<1x16x16x16xf32, #tpu.memory_space<vmem>>) attributes {dimension_semantics = [#tpu.dimension_semantics<parallel>], iteration_bounds = array<i64: 2>, scalar_prefetch = 0 : i64, scratch_operands = 0 : i64, tpu.core_type = #tpu.core_type<tc>, window_params = [{transform_indices = @transform_0, window_bounds = array<i64: 1, 48, 16>}, {pipeline_mode = #tpu.pipeline_mode<synchronous>, transform_indices = @transform_1, window_bounds = array<i64: 16, 48>}, {pipeline_mode = #tpu.pipeline_mode<synchronous>, transform_indices = @transform_2, window_bounds = array<i64: 8, 1>}, {pipeline_mode = #tpu.pipeline_mode<synchronous>, transform_indices = @transform_3, window_bounds = array<i64: 256, 48>}, {pipeline_mode = #tpu.pipeline_mode<synchronous>, transform_indices = @transform_4, window_bounds = array<i64: 256, 1>}, {pipeline_mode = #tpu.pipeline_mode<synchronous>, transform_indices = @transform_5, window_bounds = array<i64: 256, 128>}, {pipeline_mode = #tpu.pipeline_mode<synchronous>, transform_indices = @transform_6, window_bounds = array<i64: 256, 16>}, {transform_indices = @transform_7, window_bounds = array<i64: 1, 16, 16, 16>}]} {
    %c0 = arith.constant 0 : index
    %c0_0 = arith.constant 0 : index
    %c0_1 = arith.constant 0 : index
    %0 = vector.load %arg1[%c0, %c0_0, %c0_1] : memref<1x48x16xbf16, #tpu.memory_space<vmem>>, vector<1x48x16xbf16>
    %1 = vector.shape_cast %0 : vector<1x48x16xbf16> to vector<48x16xbf16>
    %c0_2 = arith.constant 0 : index
    %c0_3 = arith.constant 0 : index
    %2 = vector.load %arg2[%c0_2, %c0_3] : memref<16x48xbf16, #tpu.memory_space<vmem>>, vector<16x48xbf16>
    %cst = arith.constant dense<0.000000e+00> : vector<16x16xf32>
    %3 = tpu.matmul %2, %1, %cst {dimension_numbers = #tpu.dot_dimension_numbers<[1], [0], [0], [1], [0, 0, 1, 1], [], []>} : vector<16x48xbf16>, vector<48x16xbf16>, vector<16x16xf32> -> vector<16x16xf32>
    %4 = vector.extract_strided_slice %3 {offsets = [0, 0], sizes = [8, 16], strides = [1, 1]} : vector<16x16xf32> to vector<8x16xf32>
    %c0_4 = arith.constant 0 : index
    %c0_5 = arith.constant 0 : index
    %5 = vector.load %arg3[%c0_4, %c0_5] : memref<8x1xf32, #tpu.memory_space<vmem>>, vector<8x1xf32>
    %6 = vector.broadcast %5 : vector<8x1xf32> to vector<8x16xf32>
    %7 = arith.addf %4, %6 : vector<8x16xf32>
    %8 = vector.extract_strided_slice %3 {offsets = [8, 0], sizes = [8, 16], strides = [1, 1]} : vector<16x16xf32> to vector<8x16xf32>
    %9 = vector.shape_cast %7 : vector<8x16xf32> to vector<8x1x16xf32>
    %10 = vector.shape_cast %8 : vector<8x16xf32> to vector<8x16x1xf32>
    %11 = vector.broadcast %9 : vector<8x1x16xf32> to vector<8x16x16xf32>
    %12 = vector.broadcast %10 : vector<8x16x1xf32> to vector<8x16x16xf32>
    %13 = arith.subf %11, %12 : vector<8x16x16xf32>
    %14 = math.tanh %13 : vector<8x16x16xf32>
    %15 = vector.shape_cast %14 : vector<8x16x16xf32> to vector<128x16xf32>
    %16 = arith.truncf %15 : vector<128x16xf32> to vector<128x16xbf16>
    %c0_6 = arith.constant 0 : index
    %c0_7 = arith.constant 0 : index
    %17 = vector.load %arg6[%c0_6, %c0_7] : memref<256x128xbf16, #tpu.memory_space<vmem>>, vector<256x128xbf16>
    %cst_8 = arith.constant dense<0.000000e+00> : vector<256x16xf32>
    %18 = tpu.matmul %17, %16, %cst_8 {dimension_numbers = #tpu.dot_dimension_numbers<[1], [0], [0], [1], [0, 0, 1, 1], [], []>} : vector<256x128xbf16>, vector<128x16xbf16>, vector<256x16xf32> -> vector<256x16xf32>
    %c0_9 = arith.constant 0 : index
    %c0_10 = arith.constant 0 : index
    %19 = vector.load %arg7[%c0_9, %c0_10] : memref<256x16xf32, #tpu.memory_space<vmem>>, vector<256x16xf32>
    %20 = arith.addf %18, %19 : vector<256x16xf32>
    %c0_11 = arith.constant 0 : index
    %c0_12 = arith.constant 0 : index
    %21 = vector.load %arg4[%c0_11, %c0_12] : memref<256x48xbf16, #tpu.memory_space<vmem>>, vector<256x48xbf16>
    %cst_13 = arith.constant dense<0.000000e+00> : vector<256x16xf32>
    %22 = tpu.matmul %21, %1, %cst_13 {dimension_numbers = #tpu.dot_dimension_numbers<[1], [0], [0], [1], [0, 0, 1, 1], [], []>} : vector<256x48xbf16>, vector<48x16xbf16>, vector<256x16xf32> -> vector<256x16xf32>
    %c0_14 = arith.constant 0 : index
    %c0_15 = arith.constant 0 : index
    %23 = vector.load %arg5[%c0_14, %c0_15] : memref<256x1xf32, #tpu.memory_space<vmem>>, vector<256x1xf32>
    %24 = vector.broadcast %23 : vector<256x1xf32> to vector<256x16xf32>
    %25 = arith.addf %22, %24 : vector<256x16xf32>
    %26 = vector.shape_cast %25 : vector<256x16xf32> to vector<16x16x16xf32>
    %27 = arith.truncf %26 : vector<16x16x16xf32> to vector<16x16x16xbf16>
    %28 = vector.shape_cast %20 : vector<256x16xf32> to vector<16x16x16xf32>
    %29 = arith.truncf %28 : vector<16x16x16xf32> to vector<16x16x16xbf16>
    %cst_16 = arith.constant dense<0.000000e+00> : vector<16x16x16xf32>
    %30 = tpu.matmul %27, %29, %cst_16 {dimension_numbers = #tpu.dot_dimension_numbers<[2], [1], [1], [2], [0, 0, 0, 1, 1, 2], [0], [0]>} : vector<16x16x16xbf16>, vector<16x16x16xbf16>, vector<16x16x16xf32> -> vector<16x16x16xf32>
    %c0_17 = arith.constant 0 : index
    %c0_18 = arith.constant 0 : index
    %c0_19 = arith.constant 0 : index
    %c0_20 = arith.constant 0 : index
    %31 = vector.load %arg8[%c0_17, %c0_18, %c0_19, %c0_20] : memref<1x16x16x16xf32, #tpu.memory_space<vmem>>, vector<1x16x16x16xf32>
    %32 = vector.shape_cast %31 : vector<1x16x16x16xf32> to vector<16x16x16xf32>
    %33 = vector.shape_cast %30 : vector<16x16x16xf32> to vector<1x16x16x16xf32>
    tpu.vector_store %arg8[%c0_17, %c0_18, %c0_19, %c0_20], %33 {strides = array<i32>} : memref<1x16x16x16xf32, #tpu.memory_space<vmem>>, vector<1x16x16x16xf32>,
    return
  }
  func.func @transform_0(%arg0: i32) -> (i32, i32, i32) {
    %c0_i32 = arith.constant 0 : i32
    %c0_i32_0 = arith.constant 0 : i32
    %c0_i32_1 = arith.constant 0 : i32
    return %arg0, %c0_i32, %c0_i32_0 : i32, i32, i32
  }
  func.func @transform_1(%arg0: i32) -> (i32, i32) {
    %c0_i32 = arith.constant 0 : i32
    %c0_i32_0 = arith.constant 0 : i32
    %c0_i32_1 = arith.constant 0 : i32
    return %c0_i32, %c0_i32_0 : i32, i32
  }
  func.func @transform_2(%arg0: i32) -> (i32, i32) {
    %c0_i32 = arith.constant 0 : i32
    %c0_i32_0 = arith.constant 0 : i32
    %c0_i32_1 = arith.constant 0 : i32
    return %c0_i32, %c0_i32_0 : i32, i32
  }
  func.func @transform_3(%arg0: i32) -> (i32, i32) {
    %c0_i32 = arith.constant 0 : i32
    %c0_i32_0 = arith.constant 0 : i32
    %c0_i32_1 = arith.constant 0 : i32
    return %c0_i32, %c0_i32_0 : i32, i32
  }
  func.func @transform_4(%arg0: i32) -> (i32, i32) {
    %c0_i32 = arith.constant 0 : i32
    %c0_i32_0 = arith.constant 0 : i32
    %c0_i32_1 = arith.constant 0 : i32
    return %c0_i32, %c0_i32_0 : i32, i32
  }
  func.func @transform_5(%arg0: i32) -> (i32, i32) {
    %c0_i32 = arith.constant 0 : i32
    %c0_i32_0 = arith.constant 0 : i32
    %c0_i32_1 = arith.constant 0 : i32
    return %c0_i32, %c0_i32_0 : i32, i32
  }
  func.func @transform_6(%arg0: i32) -> (i32, i32) {
    %c0_i32 = arith.constant 0 : i32
    %c0_i32_0 = arith.constant 0 : i32
    %c0_i32_1 = arith.constant 0 : i32
    return %c0_i32, %c0_i32_0 : i32, i32
  }
  func.func @transform_7(%arg0: i32) -> (i32, i32, i32, i32) {
    %c0_i32 = arith.constant 0 : i32
    %c0_i32_0 = arith.constant 0 : i32
    %c0_i32_1 = arith.constant 0 : i32
    %c0_i32_2 = arith.constant 0 : i32
    return %arg0, %c0_i32, %c0_i32_0, %c0_i32_1 : i32, i32, i32, i32
  }
}

</mosaic_0001>

<bundles_post_ra>
// kernel: ctrgc_forward.1
= control target key start
LH: loop header
LB: loop body
LE: loop exit
PB: predicated region body
PF: predicated region fallthrough
CT: control target
= control target key end

     0   :  { %12 = vsyncpa [#allocation3], 0  ;;  %s2845_s0 = inlined_call_operand.vmem [shape: bf16[2,48,16], index: 0, kind: input, shape index: {}]   ;;  %s2846_s1 = inlined_call_operand.vmem [shape: bf16[16,48], index: 1, kind: input, shape index: {}]   ;;  %s2847_s2 = inlined_call_operand.vmem [shape: f32[8,1], index: 2, kind: input, shape index: {}]   ;;  %s2848_s3 = inlined_call_operand.vmem [shape: bf16[256,48], index: 3, kind: input, shape index: {}]   ;;  %s2849_s4 = inlined_call_operand.vmem [shape: f32[256,1], index: 4, kind: input, shape index: {}]   ;;  %s2850_s5 = inlined_call_operand.vmem [shape: bf16[256,128], index: 5, kind: input, shape index: {}]   ;;  %s2851_s6 = inlined_call_operand.vmem [shape: f32[256,16], index: 6, kind: input, shape index: {}]   ;;  %s2852_s7 = inlined_call_operand.hbm [shape: f32[2,16,16,16], index: 7, kind: output, shape index: {}]  }
   0x1   :  { %14 = vsyncpa [#allocation3 + $0x1], 0  ;;  %s2249_s24 = smov 0   ;;  %s2251_s25 = smov 0  }
   0x2   :  { %s2253_s26 = smov 0   ;;  %s2255_s27 = smov 0  }
   0x3 LB: > { %s2270_s28 = sadd.s32 4294967295, %s2204_s27   ;;  %s1815_s29 = sadd.s32 4294967294, %s2204_s27   ;;  %s2204_s27 = sphi %s2255_s27, %s2858_s27   ;;  %s2200_s26 = sphi %s2253_s26, %s2857_s26   ;;  %s2196_s25 = sphi %s2251_s25, %s2856_s25   ;;  %s2192_s24 = sphi %s2249_s24, %s2855_s24  }
   0x4   : > { %s2274_s30 = sadd.s32 1, %s2204_s27   ;;  %s179_s8 = sadd.s32 1, %s2200_s26 }
   0x5   : > { %s176_s9 = ssub.s32 %s2204_s27, %s2274_s30  ;;  %p189_p0 = scmp.ne.s32.totalorder %s2200_s26, %s2196_s25 }
   0x6   : > { %p177_p1 = scmp.eq.s32.totalorder %s176_s9, 0  ;;  %p190_p2 = scmp.eq.s32.totalorder %s2270_s28, 1 }
   0x7   : > { %p195_p3 = scmp.ne.s32.totalorder %s2196_s25, %s2192_s24  ;;  %p196_p4 = scmp.eq.s32.totalorder %s1815_s29, 1 }
   0x8   : > { %s2285_s10 = scalar_select %p177_p1, %s2200_s26, %s179_s8  }
   0x9   : > { %p2287_p5 = por %p190_p2, %p189_p0  ;;  %p2291_p6 = por %p196_p4, %p195_p3 }
   0xa   : > { %p1818_p7 = scmp.ge.s32.totalorder %s2204_s27, 1  ;;  %p240_p8 = scmp.lt.s32.totalorder %s2204_s27, 3 }
   0xc   : > { %p241_p9 = pnand %p1818_p7, %p240_p8 }
   0xd   : > { %p272_p10 = scmp.lt.s32.totalorder (!%p241_p9), %s2270_s28, 1  ;;  %s269_s20 = sand.u32 (!%p241_p9), 1, %s2196_s25  }
   0xe   : > { %244 = sbr.rel (%p241_p9) target bundleno = 846 (0x34e), region = 48  ;;  %s1819_s23 = sshll.u32 (!%p241_p9), %s269_s20, 8 }
   0xf   : > { %s2726_s9 = scalar_lea.vmem (!%p241_p9), [#allocation2], %s1819_s23  ;;  %s2039_s22 = sshll.u32 (!%p241_p9), %s2270_s28, 8 }
  0x10   : > { %s1749_s8 = scalar_lea.hbm (!%p241_p9), %s2852_s7, %s2039_s22  ;;  %s1750_s13 = sshll.u32 (!%p241_p9), %s2726_s9, 4  ;;  %s1751_s13 = int_to_ptr.vmem [resolvable:$true] %s1750_s13 }
  0x11   : > { %s1752_s14 = sshll.u32 (!%p241_p9), %s1749_s8, 4  ;;  %s1753_s14 = int_to_ptr.hbm [resolvable:$true] %s1752_s14 }
  0x13   : > { %v327_v0 = vld [vmem:[%s2847_s2] sm:$0xff]  ;;  %v2206_v1 = vmov 0   ;;  %s273_s15 = scalar_select %p272_p10, %s2270_s28, 1  ;;  %vm309_vm0 = vcmask 392192   ;;  %v343_v6 = vlaneseq  ;;  %v2024_v18 = vld [vmem:[%s2848_s3 + $0x8] sm:$0xff]  ;;  %v2025_v20 = vld [vmem:[%s2848_s3 + $0x10] sm:$0xff] }
  0x14   : > { %2094 = vset.pattern.permute.xlu0 %v2206_v1  ;;  %v2006_v5 = vld [vmem:[%s2846_s1] sm:$0xff]  ;;  %v2026_v22 = vld [vmem:[%s2848_s3 + $0x18] sm:$0xff]  ;;  %v2028_v27 = vld [vmem:[%s2848_s3 + $0x28] sm:$0xff]  ;;  %vm1267_vm1 = vcmask 130048  }
  0x15   : > { %330 = vperm.xlu0 %2094, %v327_v0   ;;  %s2051_s16 = smul.u32 24, %s273_s15  ;;  %v344_v7 = vshrl.u32 %v343_v6, 7  ;;  %v2023_v15 = vld [vmem:[%s2848_s3] sm:$0xff]  ;;  %v2029_v39 = vld [vmem:[%s2848_s3 + $0x30] sm:$0xff]  ;;  %v2030_v50 = vld [vmem:[%s2848_s3 + $0x38] sm:$0xff]  ;;  %s1738_s15 = scalar_lea.sflag [#allocation3], %s269_s20 }
  0x16   : > { %v2027_v23 = vld [vmem:[%s2848_s3 + $0x20] sm:$0xff]  ;;  %v784_v6 = vld [vmem:[%s2849_s4 + $0x8] sm:$0xff] }
  0x17   : > { %s276_s19 = scalar_lea.vmem %s2845_s0, %s2051_s16  ;;  %v351_v8 = vadd.s32 8, %v344_v7  ;;  %s2156_s16 = sshra.s32 %s1753_s14, 4  ;;  %s2157_s16 = int_to_ptr.hbm [resolvable:$true] %s2156_s16 }
  0x18   : > { %v2005_v2 = vld [vmem:[%s276_s19 + $0x10] sm:$0xff]  ;;  %v2004_v3 = vld [vmem:[%s276_s19 + $0x8] sm:$0xff]  ;;  %v2003_v4 = vld [vmem:[%s276_s19] sm:$0xff]  ;;  %s2158_s17 = scalar_lea.hbm %s2157_s16, 256  ;;  %s2162_s19 = scalar_lea.hbm %s2852_s7, 512 }
  0x19   : > { %318 = vmatpush.bf16.msra.mxu0 %v2005_v2  ;;  %1108 = vmatpush.bf16.msra.mxu2 %v2005_v2  ;;  %p2159_p11 = scmp.ne.s32.totalorder %s2157_s16, %s2158_s17  ;;  %p2163_p0 = scmp.lt.s32.totalorder %s2157_s16, %s2852_s7 }
  0x1a   : > { %2048 = vmatpush.bf16.msra.mxu3 %v2005_v2  ;;  %2098 = vset.pattern.permute.xlu2 %v351_v8  ;;  %v2031_v2 = vld [vmem:[%s2848_s3 + $0x40] sm:$0xff]  ;;  %p2164_p1 = scmp.lt.s32.totalorder %s2162_s19, %s2158_s17 }
  0x1b   : > { %2096 = vset.pattern.permute.xlu1 %v351_v8  ;;  %p2160_p12 = pnand %p2159_p11, %p2287_p5 }
  0x1c   : > { %p2165_p2 = por %p2164_p1, %p2163_p0 }
  0x1d   : > { %319 = vmatpush.bf16.msra.mxu0 %v2004_v3  ;;  %1109 = vmatpush.bf16.msra.mxu2 %v2004_v3  ;;  %p2161_p13 = pneg %p2160_p12 }
  0x1e   : > { %2049 = vmatpush.bf16.msra.mxu3 %v2004_v3  ;;  %2095 = vset.pattern.permute.xlu0 %v344_v7 }
  0x1f   : > { %p2166_p3 = pnand %p2165_p2, %p2161_p13 }
  0x21   : > { %320 = vmatpush.bf16.msra.mxu0 %v2003_v4  ;;  %1110 = vmatpush.bf16.msra.mxu2 %v2003_v4 }
  0x22   : > { %2050 = vmatpush.bf16.msra.mxu3 %v2003_v4 }
  0x24   : > { %1837 = vmatmul.msk.bf16.vlgmr.msra.gmra.mxu0 %vm309_vm0, %v2006_v5  ;;  %1966 = vmatmul.msk.bf16.vlgmr.msra.gmra.mxu2 %vm309_vm0, %v2023_v15 }
  0x34   : > { %1967 = vmatmul.msk.bf16.gmra.mxu2 %vm309_vm0, %v2024_v18 }
  0x44   : > { %1968 = vmatmul.msk.bf16.gmra.mxu2 %vm309_vm0, %v2025_v20  ;;  %v789_v20 = vld [vmem:[%s2849_s4 + $0x30] sm:$0xff] }
  0x54   : > { %1969 = vmatmul.msk.bf16.gmra.mxu2 %vm309_vm0, %v2026_v22 }
  0x64   : > { %1970 = vmatmul.msk.bf16.gmra.mxu2 %vm309_vm0, %v2027_v23 }
  0x74   : > { %1971 = vmatmul.msk.bf16.gmra.mxu2 %vm309_vm0, %v2028_v27 }
  0x84   : > { %1972 = vmatmul.msk.bf16.gmra.mxu2 %vm309_vm0, %v2029_v39  ;;  %v794_v39 = vld [vmem:[%s2849_s4 + $0x58] sm:$0xff] }
  0x87   : > { %v331_v24 = vpop.permute.xlu0 %330 }
  0x94   : > { %1973 = vmatmul.msk.bf16.gmra.mxu2 %vm309_vm0, %v2030_v50 }
  0xa1   : > { %v322_v9 = vpop.f32.mrf.mxu0 }
  0xa2   : > { %v2333_v25 = vadd.f32 %v331_v24, %v322_v9 }
  0xa4   : > { %v341_v26 = vrot.slane %v2333_v25, 7  ;;  %v340_v33 = vrot.slane %v2333_v25, 6  ;;  %v339_v45 = vrot.slane %v2333_v25, 5  ;;  %v338_v48 = vrot.slane %v2333_v25, 4  ;;  %1974 = vmatmul.msk.bf16.gmra.mxu2 %vm309_vm0, %v2031_v2 }
  0xa5   : > { %v337_v60 = vrot.slane %v2333_v25, 3  ;;  %v335_v22 = vrot.slane %v2333_v25, 1 }
  0xa6   : > { %v453_v28 = vperm.slane %v341_v26, 0  ;;  %v452_v38 = vperm.slane %v340_v33, 0  ;;  %v451_v49 = vperm.slane %v339_v45, 0  ;;  %v450_v53 = vperm.slane %v338_v48, 0  ;;  %v797_v45 = vld [vmem:[%s2849_s4 + $0x70] sm:$0xff] }
  0xa7   : > { %v447_v27 = vperm.slane %v335_v22, 0  ;;  %v804_v22 = vld [vmem:[%s2849_s4 + $0xa8] sm:$0xff] }
  0xa9   : > { %v324_v10 = vpop.f32.mrf.mxu0 }
  0xaa   : > { %v433_v11 = vperm.slane %v324_v10, 7  ;;  %v420_v12 = vperm.slane %v324_v10, 6  ;;  %v394_v13 = vperm.slane %v324_v10, 4  ;;  %v407_v14 = vperm.slane %v324_v10, 5 }
  0xab   : > { %v355_v16 = vperm.slane %v324_v10, 1  ;;  %v381_v17 = vperm.slane %v324_v10, 3  ;;  %v368_v19 = vperm.slane %v324_v10, 2  ;;  %v342_v21 = vperm.slane %v324_v10, 0 }
  0xac   : > { %444 = vperm.xlu1 %2096, %v433_v11   ;;  %438 = vperm.xlu0 %2095, %v433_v11  }
  0xad   : > { %431 = vperm.xlu2 %2098, %v420_v12  }
  0xb4   : > { %2097 = vset.pattern.permute.xlu1 %v344_v7  ;;  %2101 = vset.pattern.permute.xlu0 %v351_v8 }
  0xb5   : > { %2099 = vset.pattern.permute.xlu2 %v344_v7 }
  0xbc   : > { %425 = vperm.xlu1 %2097, %v420_v12   ;;  %405 = vperm.xlu0 %2101, %v394_v13  }
  0xbd   : > { %412 = vperm.xlu2 %2099, %v407_v14  }
  0xc4   : > { %2100 = vset.pattern.permute.xlu1 %v351_v8  ;;  %2104 = vset.pattern.permute.xlu0 %v344_v7 }
  0xc5   : > { %399 = vperm.xlu2 %2099, %v394_v13   ;;  %v785_v13 = vld [vmem:[%s2849_s4 + $0x10] sm:$0xff] }
  0xcc   : > { %418 = vperm.xlu1 %2100, %v407_v14   ;;  %360 = vperm.xlu0 %2104, %v355_v16  }
  0xcd   : > { %2103 = vset.pattern.permute.xlu2 %v351_v8 }
  0xd4   : > { %2102 = vset.pattern.permute.xlu1 %v344_v7  ;;  %2108 = vset.pattern.permute.xlu0 %v2206_v1 }
  0xd5   : > { %392 = vperm.xlu2 %2103, %v381_v17   ;;  %822 = vperm.xlu0 %2108, %v784_v6   ;;  %v809_v6 = vld [vmem:[%s2849_s4 + $0xd0] sm:$0xff] }
  0xdc   : > { %386 = vperm.xlu1 %2102, %v381_v17  }
  0xdd   : > { %379 = vperm.xlu2 %2103, %v368_v19  }
  0xe4   : > { %373 = vperm.xlu1 %2102, %v368_v19   ;;  %v2032_v19 = vld [vmem:[%s2848_s3 + $0x48] sm:$0xff] }
  0xe5   : > { %2106 = vset.pattern.permute.xlu2 %v344_v7  ;;  %v336_v7 = vrot.slane %v2333_v25, 2  ;;  %1975 = vmatmul.msk.bf16.gmra.mxu2 %vm309_vm0, %v2032_v19 }
  0xe7   : > { %v448_v11 = vperm.slane %v336_v7, 0  ;;  %v810_v7 = vld [vmem:[%s2849_s4 + $0xd8] sm:$0xff] }
  0xec   : > { %2105 = vset.pattern.permute.xlu1 %v351_v8 }
  0xed   : > { %347 = vperm.xlu2 %2106, %v342_v21  }
  0xf4   : > { %366 = vperm.xlu1 %2105, %v355_v16  }
  0xf5   : > { %2107 = vset.pattern.permute.xlu2 %v2206_v1 }
  0xfc   : > { %353 = vperm.xlu1 %2105, %v342_v21  }
 0x104   : > { %2109 = vset.pattern.permute.xlu1 %v2206_v1  ;;  %v449_v1 = vperm.slane %v337_v60, 0  ;;  %v800_v60 = vld [vmem:[%s2849_s4 + $0x88] sm:$0xff] }
 0x105   : > { %827 = vperm.xlu1 %2109, %v785_v13   ;;  %v813_v13 = vld [vmem:[%s2849_s4 + $0xf0] sm:$0xff] }
 0x107   : > { %v432_v36 = vpop.permute.xlu2 %431 }
 0x108   : > { %v475_v40 = vsub.f32 %v452_v38, %v432_v36  ;;  %v2033_v36 = vld [vmem:[%s2848_s3 + $0x50] sm:$0xff] }
 0x109   : > { %1976 = vmatmul.msk.bf16.gmra.mxu2 %vm309_vm0, %v2033_v36 }
 0x10d   : > { %847 = vperm.xlu1 %2109, %v789_v20   ;;  %v2010_v20 = vld [vmem:[%s2850_s5 + $0x18] sm:$0xff] }
 0x117   : > { %v413_v43 = vpop.permute.xlu2 %412 }
 0x118   : > { %v472_v51 = vsub.f32 %v451_v49, %v413_v43 }
 0x11e   : > { %v445_v29 = vpop.permute.xlu1 %444  ;;  %v439_v30 = vpop.permute.xlu0 %438 }
 0x11f   : > { %v477_v31 = vsub.f32 %v453_v28, %v445_v29  ;;  %v476_v32 = vsub.f32 %v453_v28, %v439_v30  ;;  %v400_v54 = vpop.permute.xlu2 %399  ;;  %v787_v29 = vld [vmem:[%s2849_s4 + $0x20] sm:$0xff]  ;;  %v788_v30 = vld [vmem:[%s2849_s4 + $0x28] sm:$0xff] }
 0x120   : > { %v470_v58 = vsub.f32 %v450_v53, %v400_v54  ;;  %837 = vperm.xlu0 %2108, %v787_v29   ;;  %842 = vperm.xlu1 %2109, %v788_v30   ;;  %v2037_v54 = vld [vmem:[%s2848_s3 + $0x70] sm:$0xff]  ;;  %v2016_v30 = vld [vmem:[%s2850_s5 + $0x48] sm:$0xff] }
 0x121   : > { %2110 = vtanh.f32 %v477_v31  ;;  %v783_v31 = vld [vmem:[%s2849_s4] sm:$0xff] }
 0x122   : > { %2112 = vtanh.f32 %v476_v32  ;;  %817 = vperm.xlu2 %2107, %v783_v31  }
 0x123   : > { %2114 = vtanh.f32 %v475_v40 }
 0x127   : > { %v2111_v34 = vpop.eup %2110 }
 0x128   : > { %v2113_v35 = vpop.eup %2112  ;;  %872 = vperm.xlu0 %2108, %v794_v39   ;;  %v534_v39 = vld [vmem:[%s2851_s6] sm:$0xff] }
 0x129   : > { %v501_v37 = vpack.c.bf16 %v2111_v34, %v2113_v35  ;;  %v2115_v44 = vpop.eup %2114  ;;  %v446_v35 = vperm.slane %v2333_v25, 0  ;;  %v791_v25 = vld [vmem:[%s2849_s4 + $0x40] sm:$0xff] }
 0x12a   : > { %857 = vperm.xlu1 %2109, %v791_v25  }
 0x12b   : > { %662 = vmatpush.bf16.msrb.mxu0 %v501_v37  ;;  %2040 = vmatpush.bf16.msra.mxu1 %v501_v37  ;;  %v2036_v37 = vld [vmem:[%s2848_s3 + $0x68] sm:$0xff] }
 0x12c   : > { %1979 = vmatmul.msk.bf16.vlgmr.msra.gmra.mxu3 %vm309_vm0, %v2036_v37 }
 0x12e   : > { %v426_v41 = vpop.permute.xlu1 %425  ;;  %v406_v52 = vpop.permute.xlu0 %405 }
 0x12f   : > { %v474_v42 = vsub.f32 %v452_v38, %v426_v41  ;;  %v471_v56 = vsub.f32 %v450_v53, %v406_v52  ;;  %v393_v62 = vpop.permute.xlu2 %392  ;;  %v2011_v52 = vld [vmem:[%s2850_s5 + $0x20] sm:$0xff]  ;;  %v2034_v53 = vld [vmem:[%s2848_s3 + $0x58] sm:$0xff] }
 0x130   : > { %v469_v4 = vsub.f32 %v449_v1, %v393_v62  ;;  %887 = vperm.xlu0 %2108, %v797_v45   ;;  %1977 = vmatmul.msk.bf16.gmra.mxu2 %vm309_vm0, %v2034_v53  ;;  %v2008_v62 = vld [vmem:[%s2850_s5 + $0x8] sm:$0xff] }
 0x131   : > { %2116 = vtanh.f32 %v474_v42 }
 0x132   : > { %2118 = vtanh.f32 %v472_v51  ;;  %v2007_v51 = vld [vmem:[%s2850_s5] sm:$0xff] }
 0x137   : > { %v2117_v46 = vpop.eup %2116  ;;  %v380_v10 = vpop.permute.xlu2 %379 }
 0x138   : > { %v500_v47 = vpack.c.bf16 %v2115_v44, %v2117_v46  ;;  %v2119_v59 = vpop.eup %2118  ;;  %v467_v12 = vsub.f32 %v448_v11, %v380_v10  ;;  %v798_v46 = vld [vmem:[%s2849_s4 + $0x78] sm:$0xff]  ;;  %v2009_v10 = vld [vmem:[%s2850_s5 + $0x10] sm:$0xff] }
 0x139   : > { %892 = vperm.xlu1 %2109, %v798_v46   ;;  %v535_v46 = vld [vmem:[%s2851_s6 + $0x8] sm:$0xff] }
 0x13a   : > { %663 = vmatpush.bf16.msrb.mxu0 %v500_v47  ;;  %2041 = vmatpush.bf16.msra.mxu1 %v500_v47  ;;  %v786_v47 = vld [vmem:[%s2849_s4 + $0x18] sm:$0xff] }
 0x13b   : > { %832 = vperm.xlu2 %2107, %v786_v47  }
 0x13c   : > { %1980 = vmatmul.msk.bf16.gmra.mxu3 %vm309_vm0, %v2037_v54 }
 0x13e   : > { %v419_v55 = vpop.permute.xlu1 %418  ;;  %v361_v26 = vpop.permute.xlu0 %360 }
 0x13f   : > { %v473_v57 = vsub.f32 %v451_v49, %v419_v55  ;;  %v464_v28 = vsub.f32 %v447_v27, %v361_v26  ;;  %v796_v55 = vld [vmem:[%s2849_s4 + $0x68] sm:$0xff]  ;;  %v2015_v26 = vld [vmem:[%s2850_s5 + $0x40] sm:$0xff] }
 0x140   : > { %882 = vperm.xlu0 %2108, %v796_v55  }
 0x141   : > { %2120 = vtanh.f32 %v473_v57  ;;  %v790_v57 = vld [vmem:[%s2849_s4 + $0x38] sm:$0xff] }
 0x142   : > { %2122 = vtanh.f32 %v471_v56  ;;  %v801_v56 = vld [vmem:[%s2849_s4 + $0x90] sm:$0xff] }
 0x143   : > { %2124 = vtanh.f32 %v470_v58  ;;  %907 = vperm.xlu1 %2109, %v801_v56   ;;  %852 = vperm.xlu2 %2107, %v790_v57   ;;  %v2427_v58 = vpop.f32.mrf.mxu2 }
 0x144   : > { %2126 = vtanh.f32 %v469_v4  ;;  %v803_v4 = vld [vmem:[%s2849_s4 + $0xa0] sm:$0xff] }
 0x147   : > { %v2121_v61 = vpop.eup %2120  ;;  %v348_v34 = vpop.permute.xlu2 %347 }
 0x148   : > { %v499_v63 = vpack.c.bf16 %v2121_v61, %v2119_v59  ;;  %v2123_v0 = vpop.eup %2122  ;;  %v462_v38 = vsub.f32 %v446_v35, %v348_v34  ;;  %v799_v59 = vld [vmem:[%s2849_s4 + $0x80] sm:$0xff]  ;;  %v793_v61 = vld [vmem:[%s2849_s4 + $0x50] sm:$0xff] }
 0x149   : > { %v2125_v3 = vpop.eup %2124  ;;  %897 = vperm.xlu0 %2108, %v799_v59  }
 0x14a   : > { %664 = vmatpush.bf16.msrb.mxu0 %v499_v63  ;;  %2042 = vmatpush.bf16.msra.mxu1 %v499_v63  ;;  %v498_v5 = vpack.c.bf16 %v2123_v0, %v2125_v3  ;;  %v2127_v14 = vpop.eup %2126  ;;  %v2012_v63 = vld [vmem:[%s2850_s5 + $0x28] sm:$0xff]  ;;  %v2035_v0 = vld [vmem:[%s2848_s3 + $0x60] sm:$0xff]  ;;  %v806_v3 = vld [vmem:[%s2849_s4 + $0xb8] sm:$0xff] }
 0x14b   : > { %902 = vperm.xlu1 %2109, %v800_v60   ;;  %867 = vperm.xlu2 %2107, %v793_v61   ;;  %v2450_v2 = vpop.f32.mrf.mxu2  ;;  %v536_v61 = vld [vmem:[%s2851_s6 + $0x10] sm:$0xff] }
 0x14c   : > { %1978 = vmatmul.msk.bf16.gmra.mxu2 %vm309_vm0, %v2035_v0 }
 0x14e   : > { %665 = vmatpush.bf16.msrb.mxu0 %v498_v5  ;;  %2043 = vmatpush.bf16.msra.mxu1 %v498_v5  ;;  %v387_v8 = vpop.permute.xlu1 %386  ;;  %v792_v5 = vld [vmem:[%s2849_s4 + $0x48] sm:$0xff] }
 0x14f   : > { %v468_v9 = vsub.f32 %v449_v1, %v387_v8  ;;  %v2038_v1 = vld [vmem:[%s2848_s3 + $0x78] sm:$0xff]  ;;  %v795_v8 = vld [vmem:[%s2849_s4 + $0x60] sm:$0xff] }
 0x150   : > { %1981 = vmatmul.msk.bf16.gmra.mxu3 %vm309_vm0, %v2038_v1 }
 0x151   : > { %2128 = vtanh.f32 %v468_v9  ;;  %932 = vperm.xlu0 %2108, %v806_v3  }
 0x152   : > { %2130 = vtanh.f32 %v467_v12  ;;  %v808_v12 = vld [vmem:[%s2849_s4 + $0xc8] sm:$0xff] }
 0x153   : > { %917 = vperm.xlu1 %2109, %v803_v4   ;;  %862 = vperm.xlu2 %2107, %v792_v5   ;;  %v2472_v9 = vpop.f32.mrf.mxu2 }
 0x156   : > { %v374_v15 = vpop.permute.xlu1 %373 }
 0x157   : > { %v2129_v16 = vpop.eup %2128  ;;  %v466_v17 = vsub.f32 %v448_v11, %v374_v15  ;;  %v2013_v11 = vld [vmem:[%s2850_s5 + $0x30] sm:$0xff] }
 0x158   : > { %v497_v18 = vpack.c.bf16 %v2127_v14, %v2129_v16  ;;  %v2131_v21 = vpop.eup %2130  ;;  %v802_v14 = vld [vmem:[%s2849_s4 + $0x98] sm:$0xff]  ;;  %v811_v16 = vld [vmem:[%s2849_s4 + $0xe0] sm:$0xff] }
 0x159   : > { %2132 = vtanh.f32 %v466_v17  ;;  %947 = vperm.xlu0 %2108, %v809_v6   ;;  %v812_v17 = vld [vmem:[%s2849_s4 + $0xe8] sm:$0xff] }
 0x15a   : > { %666 = vmatpush.bf16.msrb.mxu0 %v497_v18  ;;  %2044 = vmatpush.bf16.msra.mxu1 %v497_v18  ;;  %2134 = vtanh.f32 %v464_v28  ;;  %v805_v18 = vld [vmem:[%s2849_s4 + $0xb0] sm:$0xff] }
 0x15b   : > { %952 = vperm.xlu1 %2109, %v810_v7   ;;  %877 = vperm.xlu2 %2107, %v795_v8   ;;  %v2489_v15 = vpop.f32.mrf.mxu2  ;;  %v537_v7 = vld [vmem:[%s2851_s6 + $0x18] sm:$0xff] }
 0x15f   : > { %v2133_v23 = vpop.eup %2132 }
 0x160   : > { %v496_v24 = vpack.c.bf16 %v2131_v21, %v2133_v23  ;;  %v2135_v40 = vpop.eup %2134  ;;  %v2014_v21 = vld [vmem:[%s2850_s5 + $0x38] sm:$0xff] }
 0x161   : > { %942 = vperm.xlu0 %2108, %v808_v12  }
 0x162   : > { %667 = vmatpush.bf16.msrb.mxu0 %v496_v24  ;;  %2045 = vmatpush.bf16.msra.mxu1 %v496_v24  ;;  %v807_v24 = vld [vmem:[%s2849_s4 + $0xc0] sm:$0xff] }
 0x163   : > { %967 = vperm.xlu1 %2109, %v813_v13   ;;  %912 = vperm.xlu2 %2107, %v802_v14   ;;  %v2500_v19 = vpop.f32.mrf.mxu2 }
 0x166   : > { %v367_v32 = vpop.permute.xlu1 %366 }
 0x167   : > { %v465_v33 = vsub.f32 %v447_v27, %v367_v32  ;;  %v814_v27 = vld [vmem:[%s2849_s4 + $0xf8] sm:$0xff]  ;;  %v2017_v32 = vld [vmem:[%s2850_s5 + $0x50] sm:$0xff] }
 0x169   : > { %2136 = vtanh.f32 %v465_v33  ;;  %957 = vperm.xlu0 %2108, %v811_v16  }
 0x16a   : > { %2138 = vtanh.f32 %v462_v38  ;;  %v2019_v38 = vld [vmem:[%s2850_s5 + $0x60] sm:$0xff] }
 0x16b   : > { %962 = vperm.xlu1 %2109, %v812_v17   ;;  %927 = vperm.xlu2 %2107, %v805_v18   ;;  %v2511_v23 = vpop.f32.mrf.mxu2 }
 0x16e   : > { %v354_v41 = vpop.permute.xlu1 %353 }
 0x16f   : > { %v2137_v42 = vpop.eup %2136  ;;  %v463_v43 = vsub.f32 %v446_v35, %v354_v41  ;;  %v2018_v35 = vld [vmem:[%s2850_s5 + $0x58] sm:$0xff]  ;;  %v823_v41 = vpop.permute.xlu0 %822 }
 0x170   : > { %v495_v44 = vpack.c.bf16 %v2137_v42, %v2135_v40  ;;  %v2139_v48 = vpop.eup %2138 }
 0x171   : > { %2140 = vtanh.f32 %v463_v43 }
 0x172   : > { %668 = vmatpush.bf16.msrb.mxu0 %v495_v44  ;;  %2046 = vmatpush.bf16.msra.mxu1 %v495_v44  ;;  %v1115_v44 = vadd.f32 %v2450_v2, %v823_v41 }
 0x173   : > { %922 = vperm.xlu2 %2107, %v804_v22   ;;  %v2522_v28 = vpop.f32.mrf.mxu2 }
 0x177   : > { %v2141_v49 = vpop.eup %2140  ;;  %v828_v0 = vpop.permute.xlu1 %827 }
 0x178   : > { %v494_v50 = vpack.c.bf16 %v2141_v49, %v2139_v48  ;;  %v1118_v5 = vadd.f32 %v2472_v9, %v828_v0 }
 0x17a   : > { %669 = vmatpush.bf16.msrb.mxu0 %v494_v50  ;;  %2047 = vmatpush.bf16.msra.mxu1 %v494_v50  ;;  %v1194_v13 = vpack.c.bf16 %v1118_v5, %v1118_v5 }
 0x17b   : > { %937 = vperm.xlu2 %2107, %v807_v24   ;;  %v2524_v29 = vpop.f32.mrf.mxu2  ;;  %v2021_v24 = vld [vmem:[%s2850_s5 + $0x70] sm:$0xff] }
 0x17c   : > { %v818_v42 = vpop.permute.xlu2 %817 }
 0x17d   : > { %670 = vmatmul.bf16.vlgmr.msrb.gmra.mxu0 %v2007_v51  ;;  %690 = vmatmul.bf16.vlgmr.msra.gmra.mxu1 %v2011_v52  ;;  %v1113_v45 = vadd.f32 %v2427_v58, %v818_v42  ;;  %v1193_v52 = vpack.c.bf16 %v1115_v44, %v1115_v44  ;;  %v2020_v58 = vld [vmem:[%s2850_s5 + $0x68] sm:$0xff] }
 0x17f   : > { %v1192_v53 = vpack.c.bf16 %v1113_v45, %v1113_v45  ;;  %v1259_v57 = vunpack.c.l.b16 %v1193_v52  ;;  %v2578_v16 = vpop.permute.xlu1 %847 }
 0x181   : > { %v1258_v59 = vunpack.c.l.b16 %v1192_v53 }
 0x183   : > { %972 = vperm.xlu2 %2107, %v814_v27   ;;  %v2529_v31 = vpop.f32.mrf.mxu2  ;;  %v1260_v1 = vpack.c.b16 %v1259_v57, %v1258_v59 }
 0x18b   : > { %v2534_v33 = vpop.f32.mrf.mxu2 }
 0x18d   : > { %675 = vmatmul.bf16.gmra.mxu0 %v2008_v62  ;;  %695 = vmatmul.bf16.gmra.mxu1 %v2012_v63 }
 0x192   : > { %v838_v42 = vpop.permute.xlu0 %837 }
 0x193   : > { %v2536_v34 = vpop.f32.mrf.mxu2  ;;  %v1123_v45 = vadd.f32 %v2500_v19, %v838_v42 }
 0x195   : > { %v833_v3 = vpop.permute.xlu2 %832  ;;  %v1196_v57 = vpack.c.bf16 %v1123_v45, %v1123_v45 }
 0x196   : > { %v1120_v6 = vadd.f32 %v2489_v15, %v833_v3 }
 0x197   : > { %v1315_v5 = vunpack.c.l.b16 %v1196_v57 }
 0x198   : > { %v1195_v14 = vpack.c.bf16 %v1120_v6, %v1120_v6 }
 0x19a   : > { %v1288_v15 = vunpack.c.l.b16 %v1195_v14 }
 0x19b   : > { %v2541_v36 = vpop.f32.mrf.mxu2 }
 0x19d   : > { %680 = vmatmul.bf16.gmra.mxu0 %v2009_v10  ;;  %700 = vmatmul.bf16.gmra.mxu1 %v2013_v11 }
 0x1a3   : > { %v2543_v37 = vpop.f32.mrf.mxu2 }
 0x1ab   : > { %v2558_v50 = vpop.f32.mrf.mxu2 }
 0x1ad   : > { %685 = vmatmul.bf16.gmra.mxu0 %v2010_v20  ;;  %705 = vmatmul.bf16.gmra.mxu1 %v2014_v21  ;;  %v1287_v21 = vunpack.c.l.b16 %v1194_v13  ;;  %v540_v13 = vld [vmem:[%s2851_s6 + $0x30] sm:$0xff] }
 0x1b3   : > { %v2568_v2 = vpop.f32.mrf.mxu2 }
 0x1bb   : > { %v2580_v20 = vpop.f32.mrf.mxu2 }
 0x1bd   : > { %710 = vmatmul.bf16.gmra.mxu1 %v2015_v26  ;;  %v538_v26 = vld [vmem:[%s2851_s6 + $0x20] sm:$0xff] }
 0x1cd   : > { %715 = vmatmul.bf16.gmra.mxu1 %v2016_v30 }
 0x1dd   : > { %720 = vmatmul.bf16.gmra.mxu1 %v2017_v32  ;;  %v543_v32 = vld [vmem:[%s2851_s6 + $0x48] sm:$0xff] }
 0x1ed   : > { %725 = vmatmul.bf16.gmra.mxu1 %v2018_v35  ;;  %v853_v35 = vpop.permute.xlu2 %852 }
 0x1fa   : > { %v671_v25 = vpop.f32.mrf.mxu0  ;;  %v2551_v40 = vpop.f32.mrf.mxu1 }
 0x1fb   : > { %v672_v43 = vadd.f32 %v671_v25, %v534_v39  ;;  %v542_v39 = vld [vmem:[%s2851_s6 + $0x40] sm:$0xff] }
 0x1fc   : > { %v692_v44 = vadd.f32 %v2551_v40, %v542_v39 }
 0x1fd   : > { %730 = vmatmul.bf16.gmra.mxu1 %v2019_v38  ;;  %v1224_v47 = vpack.c.bf16 %v672_v43, %v672_v43  ;;  %v1289_v38 = vpack.c.b16 %v1288_v15, %v1287_v21  ;;  %v843_v43 = vpop.permute.xlu1 %842 }
 0x1ff   : > { %v1263_v54 = vunpack.c.l.b16 %v1224_v47  ;;  %v546_v47 = vld [vmem:[%s2851_s6 + $0x60] sm:$0xff] }
 0x202   : > { %v673_v48 = vpop.f32.mrf.mxu0  ;;  %v693_v49 = vpop.f32.mrf.mxu1 }
 0x203   : > { %v674_v51 = vadd.f32 %v673_v48, %v535_v46  ;;  %v694_v41 = vadd.f32 %v693_v49, %v543_v32  ;;  %v1125_v46 = vadd.f32 %v2511_v23, %v843_v43  ;;  %v539_v48 = vld [vmem:[%s2851_s6 + $0x28] sm:$0xff]  ;;  %v1128_v32 = vadd.f32 %v2522_v28, %v2578_v16  ;;  %v549_v28 = vld [vmem:[%s2851_s6 + $0x78] sm:$0xff] }
 0x204   : > { %v547_v49 = vld [vmem:[%s2851_s6 + $0x68] sm:$0xff] }
 0x205   : > { %v1225_v55 = vpack.c.bf16 %v674_v51, %v674_v51  ;;  %v2607_v51 = vpop.f32.mrf.mxu2  ;;  %v1233_v40 = vpack.c.bf16 %v694_v41, %v694_v41  ;;  %v1197_v59 = vpack.c.bf16 %v1125_v46, %v1125_v46  ;;  %v1198_v45 = vpack.c.bf16 %v1128_v32, %v1128_v32 }
 0x207   : > { %v1264_v56 = vunpack.c.l.b16 %v1225_v55  ;;  %v1377_v0 = vunpack.c.l.b16 %v1233_v40  ;;  %v1316_v6 = vunpack.c.l.b16 %v1197_v59 }
 0x209   : > { %v1265_v60 = vpack.c.b16 %v1264_v56, %v1263_v54  ;;  %v1232_v56 = vpack.c.bf16 %v692_v44, %v692_v44  ;;  %v541_v44 = vld [vmem:[%s2851_s6 + $0x38] sm:$0xff] }
 0x20a   : > { %v676_v62 = vpop.f32.mrf.mxu0  ;;  %v2566_v63 = vpop.f32.mrf.mxu1 }
 0x20b   : > { %1278 = vmatpush.bf16.msrb.mxu3 %v1265_v60  ;;  %v677_v4 = vadd.f32 %v676_v62, %v536_v61  ;;  %v2609_v60 = vpop.permute.xlu2 %867 }
 0x20d   : > { %735 = vmatmul.bf16.gmra.mxu1 %v2020_v58  ;;  %v1226_v8 = vpack.c.bf16 %v677_v4, %v677_v4  ;;  %v1376_v4 = vunpack.c.l.b16 %v1232_v56  ;;  %v2622_v15 = vpop.f32.mrf.mxu2  ;;  %v1343_v56 = vunpack.c.l.b16 %v1198_v45 }
 0x20e   : > { %1982 = vmatmul.msk.bf16.vlgmr.msrb.gmra.mxu3 %vm1267_vm1, %v1260_v1 }
 0x20f   : > { %v1292_v17 = vunpack.c.l.b16 %v1226_v8 }
 0x212   : > { %v678_v10 = vpop.f32.mrf.mxu0  ;;  %v2576_v11 = vpop.f32.mrf.mxu1 }
 0x213   : > { %v679_v12 = vadd.f32 %v678_v10, %v537_v7  ;;  %v2022_v10 = vld [vmem:[%s2850_s5 + $0x78] sm:$0xff]  ;;  %v863_v39 = vpop.permute.xlu2 %862 }
 0x214   : > { %v1135_v43 = vadd.f32 %v2534_v33, %v863_v39 }
 0x215   : > { %v1227_v18 = vpack.c.bf16 %v679_v12, %v679_v12  ;;  %v1378_v12 = vpack.c.b16 %v1377_v0, %v1376_v4 }
 0x217   : > { %v1293_v9 = vunpack.c.l.b16 %v1227_v18  ;;  %v2617_v18 = vpop.permute.xlu0 %872 }
 0x219   : > { %v1294_v22 = vpack.c.b16 %v1293_v9, %v1292_v17  ;;  %v545_v9 = vld [vmem:[%s2851_s6 + $0x58] sm:$0xff] }
 0x21a   : > { %v681_v27 = vpop.f32.mrf.mxu0  ;;  %v701_v30 = vpop.f32.mrf.mxu1 }
 0x21b   : > { %1306 = vmatpush.bf16.msra.mxu3 %v1294_v22  ;;  %v682_v25 = vadd.f32 %v681_v27, %v538_v26  ;;  %v702_v54 = vadd.f32 %v701_v30, %v546_v47  ;;  %v1317_v22 = vpack.c.b16 %v1316_v6, %v1315_v5  ;;  %v699_v30 = vadd.f32 %v2576_v11, %v545_v9  ;;  %v548_v11 = vld [vmem:[%s2851_s6 + $0x70] sm:$0xff] }
 0x21d   : > { %740 = vmatmul.bf16.gmra.mxu1 %v2021_v24  ;;  %v1228_v52 = vpack.c.bf16 %v682_v25, %v682_v25  ;;  %v1236_v1 = vpack.c.bf16 %v702_v54, %v702_v54  ;;  %v544_v24 = vld [vmem:[%s2851_s6 + $0x50] sm:$0xff]  ;;  %v1130_v25 = vadd.f32 %v2524_v29, %v853_v35  ;;  %v1235_v29 = vpack.c.bf16 %v699_v30, %v699_v30  ;;  %v551_v30 = vld [vmem:[%s2851_s6 + $0x88] sm:$0xff] }
 0x21e   : > { %1983 = vmatmul.msk.bf16.vlgmr.msra.gmra.mxu3 %vm1267_vm1, %v1289_v38  ;;  %v858_v38 = vpop.permute.xlu1 %857  ;;  %v697_v42 = vadd.f32 %v2566_v63, %v544_v24 }
 0x21f   : > { %v1320_v58 = vunpack.c.l.b16 %v1228_v52  ;;  %v1432_v21 = vunpack.c.l.b16 %v1236_v1  ;;  %v1133_v41 = vadd.f32 %v2529_v31, %v858_v38  ;;  %v1199_v47 = vpack.c.bf16 %v1130_v25, %v1130_v25  ;;  %v2644_v40 = vpop.permute.xlu0 %887 }
 0x220   : > { %v1201_v52 = vpack.c.bf16 %v1135_v43, %v1135_v43 }
 0x222   : > { %v683_v53 = vpop.f32.mrf.mxu0  ;;  %v703_v19 = vpop.f32.mrf.mxu1  ;;  %v1372_v0 = vunpack.c.l.b16 %v1201_v52 }
 0x223   : > { %v684_v23 = vadd.f32 %v683_v53, %v539_v48  ;;  %v704_v55 = vadd.f32 %v703_v19, %v547_v49  ;;  %v1200_v48 = vpack.c.bf16 %v1133_v41, %v1133_v41  ;;  %v1234_v49 = vpack.c.bf16 %v697_v42, %v697_v42 }
 0x225   : > { %v1229_v61 = vpack.c.bf16 %v684_v23, %v684_v23  ;;  %v1237_v62 = vpack.c.bf16 %v704_v55, %v704_v55  ;;  %v2646_v23 = vpop.f32.mrf.mxu2  ;;  %v1405_v55 = vunpack.c.l.b16 %v1235_v29 }
 0x226   : > { %v893_v6 = vpop.permute.xlu1 %892 }
 0x227   : > { %v1321_v3 = vunpack.c.l.b16 %v1229_v61  ;;  %v1433_v8 = vunpack.c.l.b16 %v1237_v62  ;;  %v1371_v61 = vunpack.c.l.b16 %v1200_v48  ;;  %v1404_v62 = vunpack.c.l.b16 %v1234_v49 }
 0x228   : > { %v1148_v48 = vadd.f32 %v2568_v2, %v2644_v40  ;;  %v1150_v49 = vadd.f32 %v2580_v20, %v893_v6  ;;  %v2677_v40 = vpop.f32.mrf.mxu3 }
 0x229   : > { %v1322_v7 = vpack.c.b16 %v1321_v3, %v1320_v58  ;;  %v1434_v26 = vpack.c.b16 %v1433_v8, %v1432_v21  ;;  %v1344_v58 = vunpack.c.l.b16 %v1199_v47  ;;  %v1406_v4 = vpack.c.b16 %v1405_v55, %v1404_v62 }
 0x22a   : > { %v686_v14 = vpop.f32.mrf.mxu0  ;;  %v706_v17 = vpop.f32.mrf.mxu1  ;;  %v1140_v21 = vadd.f32 %v2541_v36, %v2617_v18 }
 0x22b   : > { %1334 = vmatpush.bf16.msra.mxu0 %v1322_v7  ;;  %v687_v27 = vadd.f32 %v686_v14, %v540_v13  ;;  %v707_v63 = vadd.f32 %v706_v17, %v548_v11  ;;  %v1345_v8 = vpack.c.b16 %v1344_v58, %v1343_v56  ;;  %v883_v14 = vpop.permute.xlu0 %882  ;;  %v878_v17 = vpop.permute.xlu2 %877 }
 0x22c   : > { %v1203_v25 = vpack.c.bf16 %v1140_v21, %v1140_v21 }
 0x22d   : > { %745 = vmatmul.bf16.gmra.mxu1 %v2022_v10  ;;  %v1230_v16 = vpack.c.bf16 %v687_v27, %v687_v27  ;;  %v1238_v57 = vpack.c.bf16 %v707_v63, %v707_v63  ;;  %v1373_v10 = vpack.c.b16 %v1372_v0, %v1371_v61  ;;  %v2657_v24 = vpop.f32.mrf.mxu2  ;;  %v1143_v27 = vadd.f32 %v2543_v37, %v878_v17  ;;  %v552_v63 = vld [vmem:[%s2851_s6 + $0x90] sm:$0xff] }
 0x22e   : > { %1984 = vmatmul.msk.bf16.vlgmr.msra.gmra.mxu0 %vm1267_vm1, %v1317_v22  ;;  %v1138_v22 = vadd.f32 %v2536_v34, %v2609_v60  ;;  %v908_v18 = vpop.permute.xlu1 %907  ;;  %v1400_v11 = vunpack.c.l.b16 %v1203_v25 }
 0x22f   : > { %1390 = vmatpush.bf16.msrb.mxu0 %v1378_v12  ;;  %v1348_v53 = vunpack.c.l.b16 %v1230_v16  ;;  %v1460_v7 = vunpack.c.l.b16 %v1238_v57  ;;  %v550_v12 = vld [vmem:[%s2851_s6 + $0x80] sm:$0xff]  ;;  %v1204_v36 = vpack.c.bf16 %v1143_v27, %v1143_v27  ;;  %v1206_v57 = vpack.c.bf16 %v1148_v48, %v1148_v48 }
 0x230   : > { %v1202_v41 = vpack.c.bf16 %v1138_v22, %v1138_v22  ;;  %v2685_v21 = vpop.f32.mrf.mxu3 }
 0x232   : > { %v688_v35 = vpop.f32.mrf.mxu0  ;;  %v708_v31 = vpop.f32.mrf.mxu1 }
 0x233   : > { %1446 = vmatpush.bf16.msra.mxu0 %v1434_v26  ;;  %v689_v46 = vadd.f32 %v688_v35, %v541_v44  ;;  %v709_v33 = vadd.f32 %v708_v31, %v549_v28  ;;  %v1145_v26 = vadd.f32 %v2558_v50, %v883_v14  ;;  %v1399_v44 = vunpack.c.l.b16 %v1202_v41  ;;  %v913_v35 = vpop.permute.xlu2 %912 }
 0x234   : > { %v1427_v28 = vunpack.c.l.b16 %v1204_v36  ;;  %v1160_v22 = vadd.f32 %v2657_v24, %v913_v35 }
 0x235   : > { %v1231_v19 = vpack.c.bf16 %v689_v46, %v689_v46  ;;  %v1239_v54 = vpack.c.bf16 %v709_v33, %v709_v33  ;;  %v1205_v42 = vpack.c.bf16 %v1145_v26, %v1145_v26  ;;  %v1162_v16 = vpop.f32.mrf.mxu2  ;;  %v1401_v31 = vpack.c.b16 %v1400_v11, %v1399_v44  ;;  %v898_v46 = vpop.permute.xlu0 %897 }
 0x236   : > { %v903_v33 = vpop.permute.xlu1 %902  ;;  %v1153_v52 = vadd.f32 %v2607_v51, %v898_v46  ;;  %v1211_v41 = vpack.c.bf16 %v1160_v22, %v1160_v22 }
 0x237   : > { %v1349_v59 = vunpack.c.l.b16 %v1231_v19  ;;  %v1461_v3 = vunpack.c.l.b16 %v1239_v54  ;;  %v1428_v50 = vunpack.c.l.b16 %v1205_v42  ;;  %v553_v19 = vld [vmem:[%s2851_s6 + $0x98] sm:$0xff] }
 0x238   : > { %v1208_v61 = vpack.c.bf16 %v1153_v52, %v1153_v52 }
 0x239   : > { %v1350_v1 = vpack.c.b16 %v1349_v59, %v1348_v53  ;;  %v1462_v13 = vpack.c.b16 %v1461_v3, %v1460_v7  ;;  %v1429_v45 = vpack.c.b16 %v1428_v50, %v1427_v28  ;;  %v1155_v53 = vadd.f32 %v2622_v15, %v903_v33  ;;  %v2691_v28 = vpop.f32.mrf.mxu3  ;;  %v557_v33 = vld [vmem:[%s2851_s6 + $0xb8] sm:$0xff] }
 0x23a   : > { %v711_v5 = vpop.f32.mrf.mxu1  ;;  %v1207_v59 = vpack.c.bf16 %v1150_v49, %v1150_v49  ;;  %v1483_v3 = vunpack.c.l.b16 %v1208_v61 }
 0x23b   : > { %1362 = vmatpush.bf16.msrb.mxu3 %v1350_v1  ;;  %v712_v9 = vadd.f32 %v711_v5, %v550_v12  ;;  %v1209_v62 = vpack.c.bf16 %v1155_v53, %v1155_v53  ;;  %v928_v0 = vpop.permute.xlu2 %927  ;;  %v1455_v1 = vunpack.c.l.b16 %v1206_v57 }
 0x23c   : > { %v1456_v15 = vunpack.c.l.b16 %v1207_v59 }
 0x23d   : > { %v1240_v38 = vpack.c.bf16 %v712_v9, %v712_v9  ;;  %v1164_v58 = vpop.f32.mrf.mxu2  ;;  %v1158_v9 = vadd.f32 %v2646_v23, %v908_v18 }
 0x23e   : > { %1985 = vmatmul.msk.bf16.vlgmr.msrb.gmra.mxu3 %vm1267_vm1, %v1345_v8  ;;  %1986 = vmatmul.msk.bf16.vlgmr.msrb.gmra.mxu0 %vm1267_vm1, %v1373_v10  ;;  %v1457_v7 = vpack.c.b16 %v1456_v15, %v1455_v1  ;;  %v554_v10 = vld [vmem:[%s2851_s6 + $0xa0] sm:$0xff] }
 0x23f   : > { %1418 = vmatpush.bf16.msra.mxu3 %v1406_v4  ;;  %v1488_v34 = vunpack.c.l.b16 %v1240_v38  ;;  %v1484_v4 = vunpack.c.l.b16 %v1209_v62  ;;  %v1210_v25 = vpack.c.bf16 %v1158_v9, %v1158_v9 }
 0x241   : > { %v1485_v8 = vpack.c.b16 %v1484_v4, %v1483_v3  ;;  %v1511_v18 = vunpack.c.l.b16 %v1210_v25 }
 0x242   : > { %v713_v32 = vpop.f32.mrf.mxu1 }
 0x243   : > { %1474 = vmatpush.bf16.msrb.mxu3 %v1462_v13  ;;  %v714_v39 = vadd.f32 %v713_v32, %v551_v30  ;;  %v918_v13 = vpop.permute.xlu1 %917  ;;  %v923_v14 = vpop.permute.xlu2 %922  ;;  %v555_v30 = vld [vmem:[%s2851_s6 + $0xa8] sm:$0xff] }
 0x244   : > { %v1163_v26 = vadd.f32 %v1162_v16, %v918_v13  ;;  %v1165_v27 = vadd.f32 %v1164_v58, %v923_v14  ;;  %v933_v16 = vpop.permute.xlu0 %932 }
 0x245   : > { %v1241_v43 = vpack.c.bf16 %v714_v39, %v714_v39  ;;  %v1167_v12 = vpop.f32.mrf.mxu2 }
 0x246   : > { %v1212_v42 = vpack.c.bf16 %v1163_v26, %v1163_v26  ;;  %v1213_v36 = vpack.c.bf16 %v1165_v27, %v1165_v27 }
 0x247   : > { %v1489_v60 = vunpack.c.l.b16 %v1241_v43 }
 0x248   : > { %v1539_v11 = vunpack.c.l.b16 %v1212_v42  ;;  %v1540_v24 = vunpack.c.l.b16 %v1213_v36 }
 0x249   : > { %v1490_v37 = vpack.c.b16 %v1489_v60, %v1488_v34  ;;  %v1512_v60 = vunpack.c.l.b16 %v1211_v41  ;;  %v560_v41 = vld [vmem:[%s2851_s6 + $0xd0] sm:$0xff] }
 0x24a   : > { %v716_v29 = vpop.f32.mrf.mxu1  ;;  %v1541_v35 = vpack.c.b16 %v1540_v24, %v1539_v11 }
 0x24b   : > { %1502 = vmatpush.bf16.msrb.mxu0 %v1490_v37  ;;  %v717_v47 = vadd.f32 %v716_v29, %v552_v63  ;;  %v1513_v29 = vpack.c.b16 %v1512_v60, %v1511_v18  ;;  %v1168_v63 = vadd.f32 %v1167_v12, %v928_v0  ;;  %v938_v3 = vpop.permute.xlu2 %937 }
 0x24d   : > { %v1242_v55 = vpack.c.bf16 %v717_v47, %v717_v47  ;;  %v1169_v44 = vpop.f32.mrf.mxu2  ;;  %v1214_v53 = vpack.c.bf16 %v1168_v63, %v1168_v63 }
 0x24e   : > { %1987 = vmatmul.msk.bf16.vlgmr.msra.gmra.mxu3 %vm1267_vm1, %v1401_v31  ;;  %1988 = vmatmul.msk.bf16.vlgmr.msra.gmra.mxu0 %vm1267_vm1, %v1429_v45  ;;  %v556_v31 = vld [vmem:[%s2851_s6 + $0xb0] sm:$0xff]  ;;  %v1170_v46 = vadd.f32 %v1169_v44, %v933_v16 }
 0x24f   : > { %v1516_v20 = vunpack.c.l.b16 %v1242_v55  ;;  %v948_v55 = vpop.permute.xlu0 %947  ;;  %v1567_v58 = vunpack.c.l.b16 %v1214_v53  ;;  %v563_v53 = vld [vmem:[%s2851_s6 + $0xe8] sm:$0xff] }
 0x250   : > { %v1178_v36 = vadd.f32 %v2677_v40, %v948_v55 }
 0x252   : > { %v718_v54 = vpop.f32.mrf.mxu1  ;;  %v1218_v44 = vpack.c.bf16 %v1178_v36, %v1178_v36 }
 0x253   : > { %v719_v56 = vadd.f32 %v718_v54, %v553_v19  ;;  %v1215_v19 = vpack.c.bf16 %v1170_v46, %v1170_v46  ;;  %v2701_v54 = vpop.f32.mrf.mxu3  ;;  %v562_v46 = vld [vmem:[%s2851_s6 + $0xe0] sm:$0xff] }
 0x254   : > { %v1623_v16 = vunpack.c.l.b16 %v1218_v44 }
 0x255   : > { %v1243_v2 = vpack.c.bf16 %v719_v56, %v719_v56  ;;  %v1172_v48 = vpop.f32.mrf.mxu2  ;;  %v1568_v61 = vunpack.c.l.b16 %v1215_v19 }
 0x257   : > { %v1517_v51 = vunpack.c.l.b16 %v1243_v2  ;;  %v1569_v2 = vpack.c.b16 %v1568_v61, %v1567_v58  ;;  %v943_v15 = vpop.permute.xlu0 %942 }
 0x259   : > { %v1518_v5 = vpack.c.b16 %v1517_v51, %v1516_v20  ;;  %v558_v20 = vld [vmem:[%s2851_s6 + $0xc0] sm:$0xff] }
 0x25a   : > { %v721_v6 = vpop.f32.mrf.mxu1 }
 0x25b   : > { %1530 = vmatpush.bf16.msra.mxu3 %v1518_v5  ;;  %v722_v17 = vadd.f32 %v721_v6, %v554_v10  ;;  %v2706_v1 = vpop.f32.mrf.mxu3  ;;  %v1173_v5 = vadd.f32 %v1172_v48, %v938_v3 }
 0x25d   : > { %v1244_v38 = vpack.c.bf16 %v722_v17, %v722_v17  ;;  %v1174_v51 = vpop.f32.mrf.mxu2  ;;  %v1216_v13 = vpack.c.bf16 %v1173_v5, %v1173_v5  ;;  %v973_v5 = vpop.permute.xlu2 %972 }
 0x25e   : > { %1989 = vmatmul.msk.bf16.vlgmr.msrb.gmra.mxu3 %vm1267_vm1, %v1457_v7  ;;  %1990 = vmatmul.msk.bf16.vlgmr.msrb.gmra.mxu0 %vm1267_vm1, %v1485_v8  ;;  %v1175_v6 = vadd.f32 %v1174_v51, %v943_v15  ;;  %v559_v7 = vld [vmem:[%s2851_s6 + $0xc8] sm:$0xff] }
 0x25f   : > { %v1544_v34 = vunpack.c.l.b16 %v1244_v38  ;;  %v1595_v26 = vunpack.c.l.b16 %v1216_v13 }
 0x260   : > { %v1217_v14 = vpack.c.bf16 %v1175_v6, %v1175_v6 }
 0x262   : > { %v723_v32 = vpop.f32.mrf.mxu1  ;;  %v1596_v27 = vunpack.c.l.b16 %v1217_v14 }
 0x263   : > { %v724_v39 = vadd.f32 %v723_v32, %v555_v30  ;;  %v953_v30 = vpop.permute.xlu1 %952  ;;  %v2712_v32 = vpop.f32.mrf.mxu3 }
 0x264   : > { %v1597_v25 = vpack.c.b16 %v1596_v27, %v1595_v26 }
 0x265   : > { %v1245_v43 = vpack.c.bf16 %v724_v39, %v724_v39 }
 0x267   : > { %v1545_v23 = vunpack.c.l.b16 %v1245_v43  ;;  %v1180_v43 = vadd.f32 %v2685_v21, %v953_v30 }
 0x269   : > { %v1546_v50 = vpack.c.b16 %v1545_v23, %v1544_v34  ;;  %v561_v34 = vld [vmem:[%s2851_s6 + $0xd8] sm:$0xff] }
 0x26a   : > { %v726_v37 = vpop.f32.mrf.mxu1 }
 0x26b   : > { %1558 = vmatpush.bf16.msra.mxu0 %v1546_v50  ;;  %v727_v45 = vadd.f32 %v726_v37, %v556_v31  ;;  %v968_v60 = vpop.permute.xlu1 %967  ;;  %v1219_v50 = vpack.c.bf16 %v1180_v43, %v1180_v43 }
 0x26d   : > { %v1246_v49 = vpack.c.bf16 %v727_v45, %v727_v45 }
 0x26e   : > { %1991 = vmatmul.msk.bf16.vlgmr.msra.gmra.mxu3 %vm1267_vm1, %v1513_v29  ;;  %1992 = vmatmul.msk.bf16.vlgmr.msra.gmra.mxu0 %vm1267_vm1, %v1541_v35  ;;  %v1624_v29 = vunpack.c.l.b16 %v1219_v50 }
 0x26f   : > { %v1572_v57 = vunpack.c.l.b16 %v1246_v49 }
 0x270   : > { %v1625_v63 = vpack.c.b16 %v1624_v29, %v1623_v16 }
 0x272   : > { %v728_v47 = vpop.f32.mrf.mxu1 }
 0x273   : > { %v729_v52 = vadd.f32 %v728_v47, %v557_v33  ;;  %v958_v33 = vpop.permute.xlu0 %957  ;;  %v963_v47 = vpop.permute.xlu1 %962 }
 0x274   : > { %v1183_v49 = vadd.f32 %v2691_v28, %v958_v33 }
 0x275   : > { %v1247_v56 = vpack.c.bf16 %v729_v52, %v729_v52  ;;  %v1185_v52 = vadd.f32 %v2701_v54, %v963_v47 }
 0x277   : > { %v1573_v59 = vunpack.c.l.b16 %v1247_v56  ;;  %v1221_v58 = vpack.c.bf16 %v1185_v52, %v1185_v52 }
 0x279   : > { %v1574_v62 = vpack.c.b16 %v1573_v59, %v1572_v57  ;;  %v1220_v59 = vpack.c.bf16 %v1183_v49, %v1183_v49 }
 0x27a   : > { %v731_v0 = vpop.f32.mrf.mxu1 }
 0x27b   : > { %1586 = vmatpush.bf16.msrb.mxu3 %v1574_v62  ;;  %v732_v4 = vadd.f32 %v731_v0, %v558_v20  ;;  %v1651_v28 = vunpack.c.l.b16 %v1220_v59 }
 0x27d   : > { %v1248_v10 = vpack.c.bf16 %v732_v4, %v732_v4  ;;  %v564_v4 = vld [vmem:[%s2851_s6 + $0xf0] sm:$0xff] }
 0x27e   : > { %1993 = vmatmul.msk.bf16.vlgmr.msrb.gmra.mxu3 %vm1267_vm1, %v1569_v2  ;;  %v1652_v2 = vunpack.c.l.b16 %v1221_v58 }
 0x27f   : > { %v1600_v9 = vunpack.c.l.b16 %v1248_v10  ;;  %v565_v10 = vld [vmem:[%s2851_s6 + $0xf8] sm:$0xff] }
 0x280   : > { %v1653_v3 = vpack.c.b16 %v1652_v2, %v1651_v28 }
 0x282   : > { %v733_v8 = vpop.f32.mrf.mxu1 }
 0x283   : > { %v734_v12 = vadd.f32 %v733_v8, %v559_v7  ;;  %v1188_v7 = vadd.f32 %v2706_v1, %v968_v60  ;;  %v1190_v8 = vadd.f32 %v2712_v32, %v973_v5 }
 0x285   : > { %v1249_v17 = vpack.c.bf16 %v734_v12, %v734_v12 }
 0x287   : > { %v1601_v22 = vunpack.c.l.b16 %v1249_v17 }
 0x289   : > { %v1602_v38 = vpack.c.b16 %v1601_v22, %v1600_v9  ;;  %v1222_v9 = vpack.c.bf16 %v1188_v7, %v1188_v7  ;;  %v1223_v22 = vpack.c.bf16 %v1190_v8, %v1190_v8 }
 0x28a   : > { %v736_v39 = vpop.f32.mrf.mxu1 }
 0x28b   : > { %1614 = vmatpush.bf16.msrb.mxu0 %v1602_v38  ;;  %v737_v42 = vadd.f32 %v736_v39, %v560_v41  ;;  %v1679_v30 = vunpack.c.l.b16 %v1222_v9  ;;  %v1680_v32 = vunpack.c.l.b16 %v1223_v22 }
 0x28d   : > { %v1250_v11 = vpack.c.bf16 %v737_v42, %v737_v42 }
 0x28e   : > { %1994 = vmatmul.msk.bf16.vlgmr.msrb.gmra.mxu0 %vm1267_vm1, %v1597_v25  ;;  %v1681_v25 = vpack.c.b16 %v1680_v32, %v1679_v30 }
 0x28f   : > { %v1628_v37 = vunpack.c.l.b16 %v1250_v11 }
 0x291   : > { %v1280_v23 = vpop.f32.mrf.mxu3 }
 0x292   : > { %1705 = vst.msk [vmem:[%s2726_s9] sm:$0xff] %vm1267_vm1, %v1280_v23  ;;  %v738_v18 = vpop.f32.mrf.mxu1 }
 0x293   : > { %v739_v24 = vadd.f32 %v738_v18, %v561_v34 }
 0x295   : > { %v1251_v40 = vpack.c.bf16 %v739_v24, %v739_v24 }
 0x297   : > { %v1629_v21 = vunpack.c.l.b16 %v1251_v40 }
 0x299   : > { %v1630_v35 = vpack.c.b16 %v1629_v21, %v1628_v37  ;;  %v1282_v31 = vpop.f32.mrf.mxu3 }
 0x29a   : > { %1706 = vst.msk [vmem:[%s2726_s9 + $0x8] sm:$0xff] %vm1267_vm1, %v1282_v31  ;;  %v741_v45 = vpop.f32.mrf.mxu1 }
 0x29b   : > { %1642 = vmatpush.bf16.msra.mxu3 %v1630_v35  ;;  %v742_v48 = vadd.f32 %v741_v45, %v562_v46 }
 0x29d   : > { %v1252_v56 = vpack.c.bf16 %v742_v48, %v742_v48 }
 0x29e   : > { %1995 = vmatmul.msk.bf16.vlgmr.msra.gmra.mxu3 %vm1267_vm1, %v1625_v63 }
 0x29f   : > { %v1656_v62 = vunpack.c.l.b16 %v1252_v56 }
 0x2a1   : > { %v1308_v19 = vpop.f32.mrf.mxu3 }
 0x2a2   : > { %1707 = vst.msk [vmem:[%s2726_s9 + $0x10] sm:$0xff] %vm1267_vm1, %v1308_v19  ;;  %v743_v55 = vpop.f32.mrf.mxu1 }
 0x2a3   : > { %v744_v57 = vadd.f32 %v743_v55, %v563_v53 }
 0x2a5   : > { %v1253_v61 = vpack.c.bf16 %v744_v57, %v744_v57 }
 0x2a7   : > { %v1657_v0 = vunpack.c.l.b16 %v1253_v61 }
 0x2a9   : > { %v1658_v54 = vpack.c.b16 %v1657_v0, %v1656_v62  ;;  %v1310_v20 = vpop.f32.mrf.mxu3 }
 0x2aa   : > { %1708 = vst.msk [vmem:[%s2726_s9 + $0x18] sm:$0xff] %vm1267_vm1, %v1310_v20  ;;  %v746_v51 = vpop.f32.mrf.mxu1 }
 0x2ab   : > { %v1336_v15 = vpop.f32.mrf.mxu0  ;;  %1670 = vmatpush.bf16.msra.mxu0 %v1658_v54  ;;  %v747_v6 = vadd.f32 %v746_v51, %v564_v4 }
 0x2ac   : > { %1709 = vst.msk [vmem:[%s2726_s9 + $0x20] sm:$0xff] %vm1267_vm1, %v1336_v15 }
 0x2ad   : > { %v1254_v13 = vpack.c.bf16 %v747_v6, %v747_v6 }
 0x2ae   : > { %1996 = vmatmul.msk.bf16.vlgmr.msra.gmra.mxu0 %vm1267_vm1, %v1653_v3 }
 0x2af   : > { %v1684_v1 = vunpack.c.l.b16 %v1254_v13 }
 0x2b2   : > { %v748_v12 = vpop.f32.mrf.mxu1 }
 0x2b3   : > { %v749_v14 = vadd.f32 %v748_v12, %v565_v10  ;;  %v1338_v17 = vpop.f32.mrf.mxu0 }
 0x2b4   : > { %1710 = vst.msk [vmem:[%s2726_s9 + $0x28] sm:$0xff] %vm1267_vm1, %v1338_v17 }
 0x2b5   : > { %v1255_v26 = vpack.c.bf16 %v749_v14, %v749_v14 }
 0x2b7   : > { %v1685_v27 = vunpack.c.l.b16 %v1255_v26 }
 0x2b9   : > { %v1686_v38 = vpack.c.b16 %v1685_v27, %v1684_v1 }
 0x2bb   : > { %v1392_v39 = vpop.f32.mrf.mxu0  ;;  %1698 = vmatpush.bf16.msrb.mxu3 %v1686_v38 }
 0x2bc   : > { %1713 = vst.msk [vmem:[%s2726_s9 + $0x40] sm:$0xff] %vm1267_vm1, %v1392_v39 }
 0x2be   : > { %1997 = vmatmul.msk.bf16.vlgmr.msrb.gmra.mxu3 %vm1267_vm1, %v1681_v25 }
 0x2c1   : > { %v1364_v41 = vpop.f32.mrf.mxu3 }
 0x2c2   : > { %1711 = vst.msk [vmem:[%s2726_s9 + $0x30] sm:$0xff] %vm1267_vm1, %v1364_v41 }
 0x2c3   : > { %v1394_v42 = vpop.f32.mrf.mxu0 }
 0x2c4   : > { %1714 = vst.msk [vmem:[%s2726_s9 + $0x48] sm:$0xff] %vm1267_vm1, %v1394_v42 }
 0x2c9   : > { %v1366_v36 = vpop.f32.mrf.mxu3 }
 0x2ca   : > { %1712 = vst.msk [vmem:[%s2726_s9 + $0x38] sm:$0xff] %vm1267_vm1, %v1366_v36 }
 0x2cb   : > { %v1448_v43 = vpop.f32.mrf.mxu0 }
 0x2cc   : > { %1717 = vst.msk [vmem:[%s2726_s9 + $0x60] sm:$0xff] %vm1267_vm1, %v1448_v43 }
 0x2d1   : > { %v1420_v34 = vpop.f32.mrf.mxu3 }
 0x2d2   : > { %1715 = vst.msk [vmem:[%s2726_s9 + $0x50] sm:$0xff] %vm1267_vm1, %v1420_v34 }
 0x2d3   : > { %v1450_v23 = vpop.f32.mrf.mxu0 }
 0x2d4   : > { %1718 = vst.msk [vmem:[%s2726_s9 + $0x68] sm:$0xff] %vm1267_vm1, %v1450_v23 }
 0x2d9   : > { %v1422_v18 = vpop.f32.mrf.mxu3 }
 0x2da   : > { %1716 = vst.msk [vmem:[%s2726_s9 + $0x58] sm:$0xff] %vm1267_vm1, %v1422_v18 }
 0x2db   : > { %v1504_v60 = vpop.f32.mrf.mxu0 }
 0x2dc   : > { %1721 = vst.msk [vmem:[%s2726_s9 + $0x80] sm:$0xff] %vm1267_vm1, %v1504_v60 }
 0x2e1   : > { %v1476_v11 = vpop.f32.mrf.mxu3 }
 0x2e2   : > { %1719 = vst.msk [vmem:[%s2726_s9 + $0x70] sm:$0xff] %vm1267_vm1, %v1476_v11 }
 0x2e3   : > { %v1506_v24 = vpop.f32.mrf.mxu0 }
 0x2e4   : > { %1722 = vst.msk [vmem:[%s2726_s9 + $0x88] sm:$0xff] %vm1267_vm1, %v1506_v24 }
 0x2e9   : > { %v1478_v44 = vpop.f32.mrf.mxu3 }
 0x2ea   : > { %1720 = vst.msk [vmem:[%s2726_s9 + $0x78] sm:$0xff] %vm1267_vm1, %v1478_v44 }
 0x2eb   : > { %v1560_v50 = vpop.f32.mrf.mxu0 }
 0x2ec   : > { %1725 = vst.msk [vmem:[%s2726_s9 + $0xa0] sm:$0xff] %vm1267_vm1, %v1560_v50 }
 0x2f1   : > { %v1532_v40 = vpop.f32.mrf.mxu3 }
 0x2f2   : > { %1723 = vst.msk [vmem:[%s2726_s9 + $0x90] sm:$0xff] %vm1267_vm1, %v1532_v40 }
 0x2f3   : > { %v1562_v37 = vpop.f32.mrf.mxu0 }
 0x2f4   : > { %1726 = vst.msk [vmem:[%s2726_s9 + $0xa8] sm:$0xff] %vm1267_vm1, %v1562_v37 }
 0x2f9   : > { %v1534_v21 = vpop.f32.mrf.mxu3 }
 0x2fa   : > { %1724 = vst.msk [vmem:[%s2726_s9 + $0x98] sm:$0xff] %vm1267_vm1, %v1534_v21 }
 0x301   : > { %v1588_v16 = vpop.f32.mrf.mxu3 }
 0x302   : > { %1727 = vst.msk [vmem:[%s2726_s9 + $0xb0] sm:$0xff] %vm1267_vm1, %v1588_v16 }
 0x309   : > { %v1590_v29 = vpop.f32.mrf.mxu3 }
 0x30a   : > { %1728 = vst.msk [vmem:[%s2726_s9 + $0xb8] sm:$0xff] %vm1267_vm1, %v1590_v29 }
 0x30b   : > { %v1616_v35 = vpop.f32.mrf.mxu0 }
 0x30c   : > { %1729 = vst.msk [vmem:[%s2726_s9 + $0xc0] sm:$0xff] %vm1267_vm1, %v1616_v35 }
 0x313   : > { %v1618_v31 = vpop.f32.mrf.mxu0 }
 0x314   : > { %1730 = vst.msk [vmem:[%s2726_s9 + $0xc8] sm:$0xff] %vm1267_vm1, %v1618_v31 }
 0x321   : > { %v1644_v45 = vpop.f32.mrf.mxu3 }
 0x322   : > { %1731 = vst.msk [vmem:[%s2726_s9 + $0xd0] sm:$0xff] %vm1267_vm1, %v1644_v45 }
 0x329   : > { %v1646_v63 = vpop.f32.mrf.mxu3 }
 0x32a   : > { %1732 = vst.msk [vmem:[%s2726_s9 + $0xd8] sm:$0xff] %vm1267_vm1, %v1646_v63 }
 0x32b   : > { %v1672_v46 = vpop.f32.mrf.mxu0 }
 0x32c   : > { %1733 = vst.msk [vmem:[%s2726_s9 + $0xe0] sm:$0xff] %vm1267_vm1, %v1672_v46 }
 0x333   : > { %v1674_v33 = vpop.f32.mrf.mxu0 }
 0x334   : > { %1734 = vst.msk [vmem:[%s2726_s9 + $0xe8] sm:$0xff] %vm1267_vm1, %v1674_v33 }
 0x341   : > { %v1700_v47 = vpop.f32.mrf.mxu3 }
 0x342   : > { %1735 = vst.msk [vmem:[%s2726_s9 + $0xf0] sm:$0xff] %vm1267_vm1, %v1700_v47 }
 0x349   : > { %v1702_v48 = vpop.f32.mrf.mxu3 }
 0x34a   : > { %1736 = vst.msk [vmem:[%s2726_s9 + $0xf8] sm:$0xff] %vm1267_vm1, %v1702_v48 }
 0x34b   : > { %2169 = shalt.err (!%p2166_p3)
}
 0x34c   : > { %s2207_s20 = smov 128   ;;  %s2208_s9 = smov 8  }
 0x34d   : > { %2052 = dma.vmem_to_hbm [thread:$0]  (%p2287_p5), %s1751_s13, 4096, %s1753_s14, %s1738_s15, %s2207_s20, %s2207_s20, %s2208_s9  }
 0x34e PF: > { %p2058_p4 = scmp.ge.s32.totalorder %s2204_s27, 2  ;;  %s1767_s23 = sand.u32 1, %s2192_s24  }
 0x34f   : > { %s1768_s29 = scalar_lea.sflag [#allocation3], %s1767_s23 }
 0x350   : > { %p2055_p7 = pnand %p2058_p4, %p2291_p6 }
 0x352   : > { %p2056_p8 = pneg %p2055_p7 }
 0x354   : > { %2187 = dma.done.wait (%p2056_p8), %s1768_s29, 4096  }
 0x355   : > { %2189 = vsyncadd (%p2056_p8), %s1768_s29, 4294963200  ;;  %p17_p9 = scmp.ge.s32.totalorder %s2274_s30, 4   ;;  %s2855_s24 = smov %s2196_s25 }
 0x356   : > { %s2856_s25 = smov %s2200_s26  ;;  %s2857_s26 = smov %s2285_s10 }
 0x357   : > { %s2858_s27 = smov %s2274_s30  ;;  %19 = sbr.rel (!%p17_p9) target bundleno = 3 (0x3), region = 83 }
 0x35c   :  { %1774 = vsyncpa [#allocation3], 1 }
 0x35d   :  { %1776 = vsyncpa [#allocation3 + $0x1], 1 }

</bundles_post_ra>
